<compile_context>
chip_gen: v5e
topology: v5e:2x2
jax: 0.10.0
libtpu: 0.0.40
codegen_flags: <defaults>
</compile_context>

<pallas_src>
import jax
import jax.numpy as jnp
from jax.experimental import pallas as pl
from jax.experimental.pallas import tpu as pltpu


def _sigmoid(v):
    return 1.0 / (1.0 + jnp.exp(-v))


# --------------------------------------------------------------------------
# Kernel 1: GRU over time, returning only the last hidden state per row.
# --------------------------------------------------------------------------
def _gru_last_hidden_kernel(x_ref, wih_ref, whh_ref, bih_ref, bhh_ref,
                            h_out_ref, h_ref):
    # x_ref   : (1, TB, F)   input slice for the current time step
    # wih_ref : (3, F, H)    input->gate weights, gate order (r, z, n)
    # whh_ref : (3, H, H)    hidden->gate weights
    # bih_ref : (3, 1, H)    input biases
    # bhh_ref : (3, 1, H)    hidden biases
    # h_out_ref: (TB, H)     final hidden state (written at last t only)
    # h_ref   : (TB, H)      VMEM carry for the running hidden state
    t = pl.program_id(1)

    @pl.when(t == 0)
    def _():
        h_ref[...] = jnp.zeros_like(h_ref)

    x_t = x_ref[0].astype(jnp.float32)      # (TB, F)
    h_prev = h_ref[...]                     # (TB, H)

    gx_r = jnp.dot(x_t, wih_ref[0], preferred_element_type=jnp.float32) + bih_ref[0]
    gx_z = jnp.dot(x_t, wih_ref[1], preferred_element_type=jnp.float32) + bih_ref[1]
    gx_n = jnp.dot(x_t, wih_ref[2], preferred_element_type=jnp.float32) + bih_ref[2]

    gh_r = jnp.dot(h_prev, whh_ref[0], preferred_element_type=jnp.float32) + bhh_ref[0]
    gh_z = jnp.dot(h_prev, whh_ref[1], preferred_element_type=jnp.float32) + bhh_ref[1]
    gh_n = jnp.dot(h_prev, whh_ref[2], preferred_element_type=jnp.float32) + bhh_ref[2]

    r = _sigmoid(gx_r + gh_r)
    z = _sigmoid(gx_z + gh_z)
    n = jnp.tanh(gx_n + r * gh_n)
    h_new = (1.0 - z) * n + z * h_prev

    h_ref[...] = h_new

    @pl.when(t == pl.num_programs(1) - 1)
    def _():
        h_out_ref[...] = h_new.astype(h_out_ref.dtype)


# --------------------------------------------------------------------------
# Kernel 2: channel-wise fully-connected layer + sigmoid (ChannelWiseFC2d).
# --------------------------------------------------------------------------
def _channelwise_fc_kernel(h_ref, w_ref, b_ref, o_ref):
    # h_ref: (1, N, H)   hidden states of one channel
    # w_ref: (1, H, O)   that channel's FC weight (transposed)
    # b_ref: (1, 1, O)   that channel's FC bias
    # o_ref: (1, N, O)
    y = jnp.dot(h_ref[0], w_ref[0], preferred_element_type=jnp.float32) + b_ref[0]
    o_ref[0] = _sigmoid(y).astype(o_ref.dtype)


# --------------------------------------------------------------------------
# Wrapper: full ChannelWiseRNNClassifier forward.
# --------------------------------------------------------------------------
def channelwise_rnn_classifier(x, params):
    """x: (N, C, F, T) spectrogram-like input. Returns (N, C, O)."""
    N, C, F, T = x.shape
    w_ih = params["gru_w_ih"]        # (3H, F)  PyTorch layout, gates (r, z, n)
    w_hh = params["gru_w_hh"]        # (3H, H)
    b_ih = params["gru_b_ih"]        # (3H,)
    b_hh = params["gru_b_hh"]        # (3H,)
    fc_w = params["fc_w"]            # (C, O, H) per-channel nn.Linear weights
    fc_b = params["fc_b"]            # (C, O)

    H = w_hh.shape[-1]
    O = fc_w.shape[1]
    B = C * N

    # (N, C, F, T) -> (T, C, N, F) -> (T, B, F): time-major, channel-major rows.
    x_seq = jnp.transpose(x, (3, 1, 0, 2)).reshape(T, B, F)

    # GRU weights: stack per gate, transpose for row-major (x @ W) matmuls.
    wih_s = jnp.transpose(w_ih.reshape(3, H, F), (0, 2, 1))    # (3, F, H)
    whh_s = jnp.transpose(w_hh.reshape(3, H, H), (0, 2, 1))    # (3, H, H)
    bih_s = b_ih.reshape(3, 1, H)
    bhh_s = b_hh.reshape(3, 1, H)

    # Row tile: full batch when small, otherwise a multiple-of-8 tile so the
    # per-step x block stays small and the pipeline is double-buffered.
    TB = B if B <= 256 else 256
    nb = pl.cdiv(B, TB)

    h_last = pl.pallas_call(
        _gru_last_hidden_kernel,
        out_shape=jax.ShapeDtypeStruct((B, H), jnp.float32),
        grid_spec=pltpu.PrefetchScalarGridSpec(
            num_scalar_prefetch=0,
            grid=(nb, T),
            in_specs=[
                pl.BlockSpec((1, TB, F), lambda b, t: (t, b, 0)),
                pl.BlockSpec((3, F, H), lambda b, t: (0, 0, 0)),
                pl.BlockSpec((3, H, H), lambda b, t: (0, 0, 0)),
                pl.BlockSpec((3, 1, H), lambda b, t: (0, 0, 0)),
                pl.BlockSpec((3, 1, H), lambda b, t: (0, 0, 0)),
            ],
            out_specs=pl.BlockSpec((TB, H), lambda b, t: (b, 0)),
            scratch_shapes=[pltpu.VMEM((TB, H), jnp.float32)],
        ),
        compiler_params=pltpu.CompilerParams(
            dimension_semantics=("parallel", "arbitrary"),
        ),
    )(x_seq, wih_s, whh_s, bih_s, bhh_s)

    # Channel-wise FC + sigmoid.
    h_cnh = h_last.reshape(C, N, H)
    fc_w_t = jnp.transpose(fc_w, (0, 2, 1))      # (C, H, O)
    fc_b_r = fc_b.reshape(C, 1, O)

    y_cno = pl.pallas_call(
        _channelwise_fc_kernel,
        out_shape=jax.ShapeDtypeStruct((C, N, O), jnp.float32),
        grid_spec=pltpu.PrefetchScalarGridSpec(
            num_scalar_prefetch=0,
            grid=(C,),
            in_specs=[
                pl.BlockSpec((1, N, H), lambda c: (c, 0, 0)),
                pl.BlockSpec((1, H, O), lambda c: (c, 0, 0)),
                pl.BlockSpec((1, 1, O), lambda c: (c, 0, 0)),
            ],
            out_specs=pl.BlockSpec((1, N, O), lambda c: (c, 0, 0)),
        ),
        compiler_params=pltpu.CompilerParams(
            dimension_semantics=("parallel",),
        ),
    )(h_cnh, fc_w_t, fc_b_r)

    return jnp.transpose(y_cno, (1, 0, 2))       # (N, C, O)


# --------------------------------------------------------------------------
# Pure-JAX reference (same math as the PyTorch module's default path).
# --------------------------------------------------------------------------
def reference_forward(x, params):
    N, C, F, T = x.shape
    w_ih, w_hh = params["gru_w_ih"], params["gru_w_hh"]
    b_ih, b_hh = params["gru_b_ih"], params["gru_b_hh"]
    fc_w, fc_b = params["fc_w"], params["fc_b"]
    H = w_hh.shape[-1]

    xs = jnp.transpose(x, (0, 1, 3, 2)).reshape(N * C, T, F)   # (B, T, F)

    def step(h, x_t):
        gx = x_t @ w_ih.T + b_ih
        gh = h @ w_hh.T + b_hh
        r = _sigmoid(gx[:, :H] + gh[:, :H])
        z = _sigmoid(gx[:, H:2 * H] + gh[:, H:2 * H])
        n = jnp.tanh(gx[:, 2 * H:] + r * gh[:, 2 * H:])
        return (1.0 - z) * n + z * h, None

    h0 = jnp.zeros((N * C, H), jnp.float32)
    h_last, _ = jax.lax.scan(step, h0, jnp.transpose(xs, (1, 0, 2)))
    h_last = h_last.reshape(N, C, H)

    y = jnp.einsum("nch,coh->nco", h_last, fc_w) + fc_b[None, :, :]
    return _sigmoid(y)


if __name__ == "__main__":
    key = jax.random.PRNGKey(0)
    ks = jax.random.split(key, 7)

    # Small shapes consistent with the module's forward:
    # batch N=2, channels C=4, frequency bins F=16 (= GRU input_size),
    # time steps T=8, hidden_size H=32, FC out_features O=1.
    N, C, F, T = 2, 4, 16, 8
    H, O = 32, 1
    scale = 0.1

    x = jax.random.normal(ks[0], (N, C, F, T), dtype=jnp.float32)
    params = {
        "gru_w_ih": scale * jax.random.normal(ks[1], (3 * H, F), jnp.float32),
        "gru_w_hh": scale * jax.random.normal(ks[2], (3 * H, H), jnp.float32),
        "gru_b_ih": scale * jax.random.normal(ks[3], (3 * H,), jnp.float32),
        "gru_b_hh": scale * jax.random.normal(ks[4], (3 * H,), jnp.float32),
        "fc_w": scale * jax.random.normal(ks[5], (C, O, H), jnp.float32),
        "fc_b": scale * jax.random.normal(ks[6], (C, O), jnp.float32),
    }

    out = channelwise_rnn_classifier(x, params)
    jax.block_until_ready(out)

    ref = reference_forward(x, params)
    assert out.shape == (N, C, O), out.shape
    assert jnp.allclose(out, ref, atol=1e-4, rtol=1e-4), "mismatch vs reference"

    print("KERNEL_OK")
</pallas_src>

<mosaic_0001>
module attributes {stable_mosaic.version = 11 : i64} {
  func.func @_gru_last_hidden_kernel(%arg0: i32, %arg1: i32, %arg2: memref<1x8x16xf32, #tpu.memory_space<vmem>>, %arg3: memref<3x16x32xf32, #tpu.memory_space<vmem>>, %arg4: memref<3x32x32xf32, #tpu.memory_space<vmem>>, %arg5: memref<3x1x32xf32, #tpu.memory_space<vmem>>, %arg6: memref<3x1x32xf32, #tpu.memory_space<vmem>>, %arg7: memref<8x32xf32, #tpu.memory_space<vmem>>, %arg8: memref<8x32xf32, #tpu.memory_space<vmem>>) attributes {dimension_semantics = [#tpu.dimension_semantics<parallel>, #tpu.dimension_semantics<arbitrary>], iteration_bounds = array<i64: 1, 8>, scalar_prefetch = 0 : i64, scratch_operands = 1 : i64, tpu.core_type = #tpu.core_type<tc>, window_params = [{transform_indices = @transform_0, window_bounds = array<i64: 1, 8, 16>}, {pipeline_mode = #tpu.pipeline_mode<synchronous>, transform_indices = @transform_1, window_bounds = array<i64: 3, 16, 32>}, {pipeline_mode = #tpu.pipeline_mode<synchronous>, transform_indices = @transform_2, window_bounds = array<i64: 3, 32, 32>}, {pipeline_mode = #tpu.pipeline_mode<synchronous>, transform_indices = @transform_3, window_bounds = array<i64: 3, 1, 32>}, {pipeline_mode = #tpu.pipeline_mode<synchronous>, transform_indices = @transform_4, window_bounds = array<i64: 3, 1, 32>}, {transform_indices = @transform_5, window_bounds = array<i64: 8, 32>}]} {
    %c0_i32 = arith.constant 0 : i32
    %0 = arith.cmpi eq, %arg1, %c0_i32 : i32
    %1 = arith.extui %0 : i1 to i32
    %c0_i32_0 = arith.constant 0 : i32
    %2 = arith.cmpi ne, %1, %c0_i32_0 : i32
    scf.if %2 {
      %cst_54 = arith.constant 0.000000e+00 : f32
      %76 = vector.broadcast %cst_54 : f32 to vector<8x32xf32>
      %c0_55 = arith.constant 0 : index
      %c0_56 = arith.constant 0 : index
      %77 = vector.load %arg8[%c0_55, %c0_56] : memref<8x32xf32, #tpu.memory_space<vmem>>, vector<8x32xf32>
      tpu.vector_store %arg8[%c0_55, %c0_56], %76 {strides = array<i32>} : memref<8x32xf32, #tpu.memory_space<vmem>>, vector<8x32xf32>,
    } else {
    }
    %c0 = arith.constant 0 : index
    %c0_1 = arith.constant 0 : index
    %c0_2 = arith.constant 0 : index
    %3 = vector.load %arg2[%c0, %c0_1, %c0_2] : memref<1x8x16xf32, #tpu.memory_space<vmem>>, vector<1x8x16xf32>
    %4 = vector.shape_cast %3 : vector<1x8x16xf32> to vector<8x16xf32>
    %c0_3 = arith.constant 0 : index
    %c0_4 = arith.constant 0 : index
    %5 = vector.load %arg8[%c0_3, %c0_4] : memref<8x32xf32, #tpu.memory_space<vmem>>, vector<8x32xf32>
    %c0_5 = arith.constant 0 : index
    %c0_6 = arith.constant 0 : index
    %c0_7 = arith.constant 0 : index
    %6 = vector.load %arg3[%c0_5, %c0_6, %c0_7] : memref<3x16x32xf32, #tpu.memory_space<vmem>>, vector<1x16x32xf32>
    %7 = vector.shape_cast %6 : vector<1x16x32xf32> to vector<16x32xf32>
    %cst = arith.constant dense<0.000000e+00> : vector<8x32xf32>
    %8 = tpu.matmul %4, %7, %cst {dimension_numbers = #tpu.dot_dimension_numbers<[1], [0], [0], [1], [0, 0, 1, 1], [], []>} : vector<8x16xf32>, vector<16x32xf32>, vector<8x32xf32> -> vector<8x32xf32>
    %c0_8 = arith.constant 0 : index
    %c0_9 = arith.constant 0 : index
    %c0_10 = arith.constant 0 : index
    %9 = vector.load %arg5[%c0_8, %c0_9, %c0_10] : memref<3x1x32xf32, #tpu.memory_space<vmem>>, vector<1x1x32xf32>
    %10 = vector.shape_cast %9 : vector<1x1x32xf32> to vector<1x32xf32>
    %11 = vector.broadcast %10 : vector<1x32xf32> to vector<8x32xf32>
    %12 = arith.addf %8, %11 : vector<8x32xf32>
    %c1 = arith.constant 1 : index
    %c0_11 = arith.constant 0 : index
    %c0_12 = arith.constant 0 : index
    %13 = vector.load %arg3[%c1, %c0_11, %c0_12] : memref<3x16x32xf32, #tpu.memory_space<vmem>>, vector<1x16x32xf32>
    %14 = vector.shape_cast %13 : vector<1x16x32xf32> to vector<16x32xf32>
    %cst_13 = arith.constant dense<0.000000e+00> : vector<8x32xf32>
    %15 = tpu.matmul %4, %14, %cst_13 {dimension_numbers = #tpu.dot_dimension_numbers<[1], [0], [0], [1], [0, 0, 1, 1], [], []>} : vector<8x16xf32>, vector<16x32xf32>, vector<8x32xf32> -> vector<8x32xf32>
    %c1_14 = arith.constant 1 : index
    %c0_15 = arith.constant 0 : index
    %c0_16 = arith.constant 0 : index
    %16 = vector.load %arg5[%c1_14, %c0_15, %c0_16] : memref<3x1x32xf32, #tpu.memory_space<vmem>>, vector<1x1x32xf32>
    %17 = vector.shape_cast %16 : vector<1x1x32xf32> to vector<1x32xf32>
    %18 = vector.broadcast %17 : vector<1x32xf32> to vector<8x32xf32>
    %19 = arith.addf %15, %18 : vector<8x32xf32>
    %c2 = arith.constant 2 : index
    %c0_17 = arith.constant 0 : index
    %c0_18 = arith.constant 0 : index
    %20 = vector.load %arg3[%c2, %c0_17, %c0_18] : memref<3x16x32xf32, #tpu.memory_space<vmem>>, vector<1x16x32xf32>
    %21 = vector.shape_cast %20 : vector<1x16x32xf32> to vector<16x32xf32>
    %cst_19 = arith.constant dense<0.000000e+00> : vector<8x32xf32>
    %22 = tpu.matmul %4, %21, %cst_19 {dimension_numbers = #tpu.dot_dimension_numbers<[1], [0], [0], [1], [0, 0, 1, 1], [], []>} : vector<8x16xf32>, vector<16x32xf32>, vector<8x32xf32> -> vector<8x32xf32>
    %c2_20 = arith.constant 2 : index
    %c0_21 = arith.constant 0 : index
    %c0_22 = arith.constant 0 : index
    %23 = vector.load %arg5[%c2_20, %c0_21, %c0_22] : memref<3x1x32xf32, #tpu.memory_space<vmem>>, vector<1x1x32xf32>
    %24 = vector.shape_cast %23 : vector<1x1x32xf32> to vector<1x32xf32>
    %25 = vector.broadcast %24 : vector<1x32xf32> to vector<8x32xf32>
    %26 = arith.addf %22, %25 : vector<8x32xf32>
    %c0_23 = arith.constant 0 : index
    %c0_24 = arith.constant 0 : index
    %c0_25 = arith.constant 0 : index
    %27 = vector.load %arg4[%c0_23, %c0_24, %c0_25] : memref<3x32x32xf32, #tpu.memory_space<vmem>>, vector<1x32x32xf32>
    %28 = vector.shape_cast %27 : vector<1x32x32xf32> to vector<32x32xf32>
    %cst_26 = arith.constant dense<0.000000e+00> : vector<8x32xf32>
    %29 = tpu.matmul %5, %28, %cst_26 {dimension_numbers = #tpu.dot_dimension_numbers<[1], [0], [0], [1], [0, 0, 1, 1], [], []>} : vector<8x32xf32>, vector<32x32xf32>, vector<8x32xf32> -> vector<8x32xf32>
    %c0_27 = arith.constant 0 : index
    %c0_28 = arith.constant 0 : index
    %c0_29 = arith.constant 0 : index
    %30 = vector.load %arg6[%c0_27, %c0_28, %c0_29] : memref<3x1x32xf32, #tpu.memory_space<vmem>>, vector<1x1x32xf32>
    %31 = vector.shape_cast %30 : vector<1x1x32xf32> to vector<1x32xf32>
    %32 = vector.broadcast %31 : vector<1x32xf32> to vector<8x32xf32>
    %33 = arith.addf %29, %32 : vector<8x32xf32>
    %c1_30 = arith.constant 1 : index
    %c0_31 = arith.constant 0 : index
    %c0_32 = arith.constant 0 : index
    %34 = vector.load %arg4[%c1_30, %c0_31, %c0_32] : memref<3x32x32xf32, #tpu.memory_space<vmem>>, vector<1x32x32xf32>
    %35 = vector.shape_cast %34 : vector<1x32x32xf32> to vector<32x32xf32>
    %cst_33 = arith.constant dense<0.000000e+00> : vector<8x32xf32>
    %36 = tpu.matmul %5, %35, %cst_33 {dimension_numbers = #tpu.dot_dimension_numbers<[1], [0], [0], [1], [0, 0, 1, 1], [], []>} : vector<8x32xf32>, vector<32x32xf32>, vector<8x32xf32> -> vector<8x32xf32>
    %c1_34 = arith.constant 1 : index
    %c0_35 = arith.constant 0 : index
    %c0_36 = arith.constant 0 : index
    %37 = vector.load %arg6[%c1_34, %c0_35, %c0_36] : memref<3x1x32xf32, #tpu.memory_space<vmem>>, vector<1x1x32xf32>
    %38 = vector.shape_cast %37 : vector<1x1x32xf32> to vector<1x32xf32>
    %39 = vector.broadcast %38 : vector<1x32xf32> to vector<8x32xf32>
    %40 = arith.addf %36, %39 : vector<8x32xf32>
    %c2_37 = arith.constant 2 : index
    %c0_38 = arith.constant 0 : index
    %c0_39 = arith.constant 0 : index
    %41 = vector.load %arg4[%c2_37, %c0_38, %c0_39] : memref<3x32x32xf32, #tpu.memory_space<vmem>>, vector<1x32x32xf32>
    %42 = vector.shape_cast %41 : vector<1x32x32xf32> to vector<32x32xf32>
    %cst_40 = arith.constant dense<0.000000e+00> : vector<8x32xf32>
    %43 = tpu.matmul %5, %42, %cst_40 {dimension_numbers = #tpu.dot_dimension_numbers<[1], [0], [0], [1], [0, 0, 1, 1], [], []>} : vector<8x32xf32>, vector<32x32xf32>, vector<8x32xf32> -> vector<8x32xf32>
    %c2_41 = arith.constant 2 : index
    %c0_42 = arith.constant 0 : index
    %c0_43 = arith.constant 0 : index
    %44 = vector.load %arg6[%c2_41, %c0_42, %c0_43] : memref<3x1x32xf32, #tpu.memory_space<vmem>>, vector<1x1x32xf32>
    %45 = vector.shape_cast %44 : vector<1x1x32xf32> to vector<1x32xf32>
    %46 = vector.broadcast %45 : vector<1x32xf32> to vector<8x32xf32>
    %47 = arith.addf %43, %46 : vector<8x32xf32>
    %48 = arith.addf %12, %33 : vector<8x32xf32>
    %cst_44 = arith.constant 0.000000e+00 : f32
    %49 = vector.broadcast %cst_44 : f32 to vector<8x32xf32>
    %50 = arith.subf %49, %48 : vector<8x32xf32>
    %51 = math.exp %50 : vector<8x32xf32>
    %cst_45 = arith.constant 1.000000e+00 : f32
    %52 = vector.broadcast %cst_45 : f32 to vector<8x32xf32>
    %53 = arith.addf %52, %51 : vector<8x32xf32>
    %cst_46 = arith.constant 1.000000e+00 : f32
    %54 = vector.broadcast %cst_46 : f32 to vector<8x32xf32>
    %55 = arith.divf %54, %53 : vector<8x32xf32>
    %56 = arith.addf %19, %40 : vector<8x32xf32>
    %cst_47 = arith.constant 0.000000e+00 : f32
    %57 = vector.broadcast %cst_47 : f32 to vector<8x32xf32>
    %58 = arith.subf %57, %56 : vector<8x32xf32>
    %59 = math.exp %58 : vector<8x32xf32>
    %cst_48 = arith.constant 1.000000e+00 : f32
    %60 = vector.broadcast %cst_48 : f32 to vector<8x32xf32>
    %61 = arith.addf %60, %59 : vector<8x32xf32>
    %cst_49 = arith.constant 1.000000e+00 : f32
    %62 = vector.broadcast %cst_49 : f32 to vector<8x32xf32>
    %63 = arith.divf %62, %61 : vector<8x32xf32>
    %64 = arith.mulf %55, %47 : vector<8x32xf32>
    %65 = arith.addf %26, %64 : vector<8x32xf32>
    %66 = math.tanh %65 : vector<8x32xf32>
    %cst_50 = arith.constant 1.000000e+00 : f32
    %67 = vector.broadcast %cst_50 : f32 to vector<8x32xf32>
    %68 = arith.subf %67, %63 : vector<8x32xf32>
    %69 = arith.mulf %68, %66 : vector<8x32xf32>
    %70 = arith.mulf %63, %5 : vector<8x32xf32>
    %71 = arith.addf %69, %70 : vector<8x32xf32>
    %c0_51 = arith.constant 0 : index
    %c0_52 = arith.constant 0 : index
    %72 = vector.load %arg8[%c0_51, %c0_52] : memref<8x32xf32, #tpu.memory_space<vmem>>, vector<8x32xf32>
    tpu.vector_store %arg8[%c0_51, %c0_52], %71 {strides = array<i32>} : memref<8x32xf32, #tpu.memory_space<vmem>>, vector<8x32xf32>,
    %c7_i32 = arith.constant 7 : i32
    %73 = arith.cmpi eq, %arg1, %c7_i32 : i32
    %74 = arith.extui %73 : i1 to i32
    %c0_i32_53 = arith.constant 0 : i32
    %75 = arith.cmpi ne, %74, %c0_i32_53 : i32
    scf.if %75 {
      %c0_54 = arith.constant 0 : index
      %c0_55 = arith.constant 0 : index
      %76 = vector.load %arg7[%c0_54, %c0_55] : memref<8x32xf32, #tpu.memory_space<vmem>>, vector<8x32xf32>
      tpu.vector_store %arg7[%c0_54, %c0_55], %71 {strides = array<i32>} : memref<8x32xf32, #tpu.memory_space<vmem>>, vector<8x32xf32>,
    } else {
    }
    return
  }
  func.func @transform_0(%arg0: i32, %arg1: i32) -> (i32, i32, i32) {
    %c0_i32 = arith.constant 0 : i32
    %c0_i32_0 = arith.constant 0 : i32
    return %arg1, %arg0, %c0_i32 : i32, i32, i32
  }
  func.func @transform_1(%arg0: i32, %arg1: i32) -> (i32, i32, i32) {
    %c0_i32 = arith.constant 0 : i32
    %c0_i32_0 = arith.constant 0 : i32
    %c0_i32_1 = arith.constant 0 : i32
    %c0_i32_2 = arith.constant 0 : i32
    return %c0_i32, %c0_i32_0, %c0_i32_1 : i32, i32, i32
  }
  func.func @transform_2(%arg0: i32, %arg1: i32) -> (i32, i32, i32) {
    %c0_i32 = arith.constant 0 : i32
    %c0_i32_0 = arith.constant 0 : i32
    %c0_i32_1 = arith.constant 0 : i32
    %c0_i32_2 = arith.constant 0 : i32
    return %c0_i32, %c0_i32_0, %c0_i32_1 : i32, i32, i32
  }
  func.func @transform_3(%arg0: i32, %arg1: i32) -> (i32, i32, i32) {
    %c0_i32 = arith.constant 0 : i32
    %c0_i32_0 = arith.constant 0 : i32
    %c0_i32_1 = arith.constant 0 : i32
    %c0_i32_2 = arith.constant 0 : i32
    return %c0_i32, %c0_i32_0, %c0_i32_1 : i32, i32, i32
  }
  func.func @transform_4(%arg0: i32, %arg1: i32) -> (i32, i32, i32) {
    %c0_i32 = arith.constant 0 : i32
    %c0_i32_0 = arith.constant 0 : i32
    %c0_i32_1 = arith.constant 0 : i32
    %c0_i32_2 = arith.constant 0 : i32
    return %c0_i32, %c0_i32_0, %c0_i32_1 : i32, i32, i32
  }
  func.func @transform_5(%arg0: i32, %arg1: i32) -> (i32, i32) {
    %c0_i32 = arith.constant 0 : i32
    %c0_i32_0 = arith.constant 0 : i32
    return %arg0, %c0_i32 : i32, i32
  }
}

</mosaic_0001>

<bundles_post_ra>
// kernel: tpu_custom_call.1
= control target key start
LH: loop header
LB: loop body
LE: loop exit
PB: predicated region body
PF: predicated region fallthrough
CT: control target
= control target key end

     0   :  { %10 = vsyncpa [#allocation4], 0  ;;  %s1194_s0 = inlined_call_operand.hbm [shape: f32[8,8,16], index: 0, kind: input, shape index: {}]   ;;  %s1195_s1 = inlined_call_operand.hbm [shape: f32[3,16,32], index: 1, kind: input, shape index: {}]   ;;  %s1196_s2 = inlined_call_operand.hbm [shape: f32[3,32,32], index: 2, kind: input, shape index: {}]   ;;  %s1197_s3 = inlined_call_operand.hbm [shape: f32[3,1,32], index: 3, kind: input, shape index: {}]   ;;  %s1198_s4 = inlined_call_operand.vmem [shape: f32[3,1,32], index: 4, kind: input, shape index: {}]   ;;  %s1199_s5 = inlined_call_operand.hbm [shape: f32[8,32], index: 5, kind: output, shape index: {}]  }
   0x1   :  { %12 = vsyncpa [#allocation4 + $0x1], 0 }
   0x2   :  { %13 = vsyncpa [#allocation7], 0 }
   0x3   :  { %14 = vsyncpa [#allocation10], 0 }
   0x4   :  { %15 = vsyncpa [#allocation5], 0  ;;  %s1033_s18 = smov 0   ;;  %s1035_s19 = smov 0  }
   0x5   :  { %s1037_s20 = smov 0   ;;  %s1039_s21 = smov 0  }
   0x6   :  { %s1041_s22 = smov 0   ;;  %s1043_s23 = smov 0  }
   0x7 LB: > { %s1200_s24 = sadd.s32 4294967295, %s992_s23   ;;  %p642_p0 = scmp.ge.s32.totalorder %s992_s23, 1  ;;  %s992_s23 = sphi %s1043_s23, %s21_s23   ;;  %s988_s22 = sphi %s1041_s22, %s1211_s22   ;;  %s984_s21 = sphi %s1039_s21, %s1210_s21   ;;  %s980_s20 = sphi %s1037_s20, %s1209_s20   ;;  %s976_s19 = sphi %s1035_s19, %s1208_s19   ;;  %s972_s18 = sphi %s1033_s18, %s1207_s18  }
   0x8   : > { %p1067_p1 = scmp.eq.s32.totalorder %s1200_s24, 0  ;;  %p176_p2 = scmp.lt.s32.totalorder %s992_s23, 9 }
   0x9   : > { %s187_s28 = sshll.u32 %s1195_s1, 4  ;;  %s994_s30 = smov [#allocation6]   ;;  %s188_s28 = int_to_ptr.hbm [resolvable:$true] %s187_s28 }
   0xa   : > { %p1075_p3 = pnand %p642_p0, %p176_p2  ;;  %s189_s6 = sshll.u32 %s994_s30, 4  ;;  %s190_s6 = int_to_ptr.vmem [resolvable:$true] %s189_s6 }
   0xb   : > { %s201_s10 = sshll.u32 %s1196_s2, 4  ;;  %s995_s11 = smov 128   ;;  %s202_s10 = int_to_ptr.hbm [resolvable:$true] %s201_s10 }
   0xc   : > { %p686_p4 = pneg %p1075_p3  ;;  %s996_s12 = smov 8  }
   0xd   : > { %s997_s13 = smov [#allocation8]   ;;  %s215_s17 = sshll.u32 %s1197_s3, 4  ;;  %s216_s17 = int_to_ptr.hbm [resolvable:$true] %s215_s17 }
   0xe   : > { %p1083_p5 = pnand %p686_p4, %p1067_p1  ;;  %s203_s14 = sshll.u32 %s997_s13, 4  ;;  %s204_s14 = int_to_ptr.vmem [resolvable:$true] %s203_s14 }
   0xf   : > { %s998_s26 = smov [#allocation9]   ;;  %s1000_s30 = smov 1  }
  0x10   : > { %689 = dma.hbm_to_vmem [thread:$0]  (!%p1083_p5), %s188_s28, 768, %s190_s6, [#allocation7], %s995_s11, %s995_s11, %s996_s12  }
  0x11   : > { %692 = dma.hbm_to_vmem [thread:$0]  (!%p1083_p5), %s202_s10, 1536, %s204_s14, [#allocation7], %s995_s11, %s995_s11, %s996_s12  }
  0x12   : > { %s217_s27 = sshll.u32 %s998_s26, 4  ;;  %s999_s28 = smov 16   ;;  %s218_s27 = int_to_ptr.vmem [resolvable:$true] %s217_s27 }
  0x13   : > { %695 = dma.hbm_to_vmem [thread:$0]  (!%p1083_p5), %s216_s17, 48, %s218_s27, [#allocation10], %s999_s28, %s999_s28, %s1000_s30  }
  0x14   : > { %s30_s6 = sadd.s32 1, %s988_s22  ;;  %p49_p7 = scmp.ne.s32.totalorder %s980_s20, %s976_s19 }
  0x15   : > { %p31_p6 = scmp.ge.s32.totalorder %s30_s6, 8  ;;  %p50_p8 = scmp.eq.s32.totalorder %s992_s23, 0 }
  0x16   : > { %s42_s8 = sadd.s32 1, %s980_s20  ;;  %p55_p9 = scmp.ne.s32.totalorder %s976_s19, %s972_s18 }
  0x17   : > { %s1213_s6 = smov (%p31_p6, %s30_s6), 0  ;;  %p1110_p10 = por %p50_p8, %p49_p7 }
  0x18   : > { %s37_s9 = ssub.s32 %s988_s22, %s1213_s6  ;;  %p1116_p12 = por %p1067_p1, %p55_p9 }
  0x19   : > { %p40_p11 = scmp.eq.s32.totalorder %s37_s9, 0  ;;  %s234_s11 = sand.u32 1, %s980_s20  }
  0x1a   : > { %s648_s12 = sshll.u32 %s988_s22, 3  ;;  %p703_p13 = scmp.lt.s32.totalorder %s992_s23, 8 }
  0x1b   : > { %s1123_s13 = scalar_select %p40_p11, %s980_s20, %s42_s8  }
  0x1c   : > { %s647_s14 = sshll.u32 %s234_s11, 3  ;;  %s243_s16 = scalar_lea.hbm %s1194_s0, %s648_s12 }
  0x1d   : > { %s245_s17 = sshll.u32 %s243_s16, 4  ;;  %s238_s26 = scalar_lea.vmem [#allocation3], %s647_s14  ;;  %s246_s17 = int_to_ptr.hbm [resolvable:$true] %s245_s17 }
  0x1e   : > { %s247_s27 = sshll.u32 %s238_s26, 4  ;;  %p697_p0 = pnand %p703_p13, %p1110_p10  ;;  %s248_s27 = int_to_ptr.vmem [resolvable:$true] %s247_s27 }
  0x1f   : > { %s235_s28 = scalar_lea.sflag [#allocation4], %s234_s11  ;;  %256 = sbr.rel (%p1075_p3) target bundleno = 248 (0xf8), region = 40 }
  0x20   : > { %699 = dma.hbm_to_vmem [thread:$0]  (!%p697_p0), %s246_s17, 128, %s248_s27, %s235_s28  }
  0x21   : > { %s258_s30 = sand.u32 (!%p1075_p3), 1, %s976_s19  }
  0x22   : > { %s650_s8 = sshll.u32 (!%p1075_p3), %s258_s30, 3  ;;  %s259_s9 = scalar_lea.sflag (!%p1075_p3), [#allocation4], %s258_s30 }
  0x23   : > { %s262_s24 = scalar_lea.vmem (!%p1075_p3), [#allocation3], %s650_s8 }
  0x24   : > { %955 = dma.done.wait (%p1116_p12), %s259_s9, 128  }
  0x25   : > { %957 = vsyncadd (%p1116_p12), %s259_s9, 4294967168 }
  0x26   : > { %959 = dma.done.wait (%p1067_p1), [#allocation7], 2304  }
  0x27   : > { %961 = vsyncadd (%p1067_p1), [#allocation7], 4294964992 }
  0x28   : > { %963 = dma.done.wait (%p1067_p1), [#allocation10], 48  }
  0x29   : > { %965 = vsyncadd (%p1067_p1), [#allocation10], 4294967248  ;;  %p654_p2 = scmp.ne.s32.totalorder %s984_s21, 0 }
  0x2b   : > { %303 = sbr.rel (%p654_p2) target bundleno = 50 (0x32), region = 60 }
  0x30   : > { %vm304_vm0 = vcmask 261120   ;;  %v1001_v0 = vmov 0.0  }
  0x31   : > { %305 = vst.msk [vmem:[#allocation2] sm:$0xff] %vm304_vm0, %v1001_v0 }
  0x32 PF: > { %v309_v1 = vld [vmem:[#allocation6 + $0x8] sm:$0xff]  ;;  %v308_v3 = vld [vmem:[#allocation6] sm:$0xff]  ;;  %v306_v5 = vld [vmem:[%s262_s24] sm:$0xff]  ;;  %vm314_vm1 = vcmask 130048   ;;  %vm402_vm2 = vcmask 261120   ;;  %p663_p1 = scmp.ne.s32.totalorder %s984_s21, 7 }
  0x33   : > { %v397_v2 = vld [vmem:[#allocation8 + $0x18] sm:$0xff]  ;;  %332 = vmatpush.msra.mxu0 %v309_v1  ;;  %v396_v4 = vld [vmem:[#allocation8 + $0x10] sm:$0xff]  ;;  %v395_v6 = vld [vmem:[#allocation8 + $0x8] sm:$0xff] }
  0x34   : > { %418 = vmatpush.msra.mxu3 %v397_v2  ;;  %v430_v7 = vld [vmem:[#allocation8 + $0x38] sm:$0xff]  ;;  %v340_v8 = vld [vmem:[#allocation6 + $0x18] sm:$0xff]  ;;  %v394_v9 = vld [vmem:[#allocation8] sm:$0xff] }
  0x35   : > { %333 = vmatpush.msra.mxu0 %v308_v3  ;;  %v429_v10 = vld [vmem:[#allocation8 + $0x30] sm:$0xff]  ;;  %360 = vmatpush.msra.mxu1 %v340_v8  ;;  %v339_v11 = vld [vmem:[#allocation6 + $0x10] sm:$0xff]  ;;  %v428_v13 = vld [vmem:[#allocation8 + $0x28] sm:$0xff] }
  0x36   : > { %419 = vmatpush.msra.mxu3 %v396_v4  ;;  %655 = vmatmul.msk.f32.vlgmr.msra.gmra.mxu0 %vm314_vm1, %v306_v5  ;;  %v368_v14 = vld [vmem:[#allocation6 + $0x28] sm:$0xff]  ;;  %v427_v15 = vld [vmem:[#allocation8 + $0x20] sm:$0xff]  ;;  %v459_v17 = vld [vmem:[#allocation8 + $0x50] sm:$0xff] }
  0x37   : > { %448 = vmatpush.msrb.mxu0 %v430_v7  ;;  %361 = vmatpush.msra.mxu1 %v339_v11  ;;  %v460_v16 = vld [vmem:[#allocation8 + $0x58] sm:$0xff]  ;;  %v367_v18 = vld [vmem:[#allocation6 + $0x20] sm:$0xff]  ;;  %v458_v19 = vld [vmem:[#allocation8 + $0x48] sm:$0xff] }
  0x38   : > { %420 = vmatpush.msra.mxu3 %v395_v6  ;;  %v1148_v12 = vld [vmem:[#allocation2] sm:$0xff]  ;;  %388 = vmatpush.msra.mxu2 %v368_v14  ;;  %v457_v20 = vld [vmem:[#allocation8 + $0x40] sm:$0xff] }
  0x39   : > { %449 = vmatpush.msrb.mxu0 %v429_v10  ;;  %656 = vmatmul.msk.f32.vlgmr.msra.gmra.mxu1 %vm314_vm1, %v306_v5  ;;  %v767_v22 = vld [vmem:[#allocation9 + $0x1] ss:$0 sm:$0xff]  ;;  %v766_v24 = vld [vmem:[#allocation9] ss:$0 sm:$0xff]  ;;  %v768_v25 = vld [vmem:[%s1198_s4 + $0x1] ss:$0 sm:$0xff] }
  0x3a   : > { %421 = vmatpush.msra.mxu3 %v394_v9  ;;  %478 = vmatpush.msrb.mxu1 %v460_v16  ;;  %v769_v27 = vld [vmem:[%s1198_s4] ss:$0 sm:$0xff]  ;;  %v770_v48 = vld [vmem:[%s1198_s4 + $0x2] ss:$0 sm:$0xff]  ;;  %v771_v54 = vld [vmem:[#allocation9 + $0x2] ss:$0 sm:$0xff] }
  0x3b   : > { %658 = vmatmul.msk.f32.vlgmr.msra.gmra.mxu3 %vm402_vm2, %v1148_v12  ;;  %450 = vmatpush.msrb.mxu0 %v428_v13 }
  0x3c   : > { %389 = vmatpush.msra.mxu2 %v367_v18  ;;  %479 = vmatpush.msrb.mxu1 %v459_v17 }
  0x3d   : > { %451 = vmatpush.msrb.mxu0 %v427_v15  ;;  %657 = vmatmul.msk.f32.vlgmr.msra.gmra.mxu2 %vm314_vm1, %v306_v5 }
  0x3e   : > { %660 = vmatmul.msk.f32.vlgmr.msrb.gmra.mxu0 %vm402_vm2, %v1148_v12  ;;  %480 = vmatpush.msrb.mxu1 %v458_v19 }
  0x40   : > { %481 = vmatpush.msrb.mxu1 %v457_v20 }
  0x41   : > { %662 = vmatmul.msk.f32.vlgmr.msrb.gmra.mxu1 %vm402_vm2, %v1148_v12 }
  0xb3   : > { %v335_v21 = vpop.f32.mrf.mxu0 }
  0xb4   : > { %v336_v29 = vadd.f32 %v766_v24, %v335_v21 }
  0xb6   : > { %v363_v23 = vpop.f32.mrf.mxu1 }
  0xb7   : > { %v364_v26 = vadd.f32 %v767_v22, %v363_v23 }
  0xbb   : > { %v453_v28 = vpop.f32.mrf.mxu0 }
  0xbc   : > { %v454_v30 = vadd.f32 %v768_v25, %v453_v28 }
  0xbe   : > { %v423_v31 = vpop.f32.mrf.mxu3  ;;  %v506_v32 = vadd.f32 %v454_v30, %v364_v26  ;;  %v483_v50 = vpop.f32.mrf.mxu1 }
  0xbf   : > { %v424_v33 = vadd.f32 %v769_v27, %v423_v31  ;;  %v484_v57 = vadd.f32 %v770_v48, %v483_v50 }
  0xc0   : > { %v507_v34 = vsub.f32 0.0, %v506_v32  ;;  %v391_v56 = vpop.f32.mrf.mxu2 }
  0xc1   : > { %v486_v35 = vadd.f32 %v424_v33, %v336_v29  ;;  %v392_v61 = vadd.f32 %v771_v54, %v391_v56 }
  0xc2   : > { %v508_v36 = vmul.f32 1.442695, %v507_v34 }
  0xc3   : > { %v487_v37 = vsub.f32 0.0, %v486_v35 }
  0xc4   : > { %772 = vpow2.f32 %v508_v36 }
  0xc5   : > { %v488_v38 = vmul.f32 1.442695, %v487_v37 }
  0xc7   : > { %774 = vpow2.f32 %v488_v38 }
  0xca   : > { %v773_v39 = vpop.eup %772 }
  0xcb   : > { %v510_v40 = vadd.f32 1.0, %v773_v39 }
  0xcd   : > { %v775_v41 = vpop.eup %774  ;;  %776 = vrcp.f32 %v510_v40  ;;  %v522_v62 = vand.u32 2147483648, %v510_v40  ;;  %vm516_vm7 = vweird.f32 %v510_v40  ;;  %v520_v2 = vand.u32 2147483647, %v510_v40 }
  0xce   : > { %v490_v42 = vadd.f32 1.0, %v775_v41 }
  0xcf   : > { %v523_v3 = vor.u32 1.1754944e-38, %v522_v62  ;;  %vm521_vm10 = vcmp.eq.f32.partialorder %v520_v2, 8.507059e+37 }
  0xd0   : > { %778 = vrcp.f32 %v490_v42  ;;  %v502_v51 = vand.u32 2147483648, %v490_v42  ;;  %v500_v53 = vand.u32 2147483647, %v490_v42  ;;  %vm496_vm4 = vweird.f32 %v490_v42 }
  0xd2   : > { %v503_v59 = vor.u32 1.1754944e-38, %v502_v51  ;;  %vm501_vm6 = vcmp.eq.f32.partialorder %v500_v53, 8.507059e+37 }
  0xd3   : > { %v777_v43 = vpop.eup %776 }
  0xd4   : > { %v512_v44 = vmul.f32 %v777_v43, %v510_v40  ;;  %vm517_vm8 = vweird.f32 %v777_v43 }
  0xd5   : > { %vm518_vm9 = vmor %vm516_vm7, %vm517_vm8 }
  0xd6   : > { %v779_v45 = vpop.eup %778  ;;  %v513_v47 = vsub.f32 1.0, %v512_v44 }
  0xd7   : > { %v492_v46 = vmul.f32 %v779_v45, %v490_v42  ;;  %vm497_vm3 = vweird.f32 %v779_v45 }
  0xd8   : > { %v514_v55 = vmul.f32 %v777_v43, %v513_v47  ;;  %vm498_vm5 = vmor %vm496_vm4, %vm497_vm3 }
  0xd9   : > { %v493_v49 = vsub.f32 1.0, %v492_v46 }
  0xda   : > { %v515_v0 = vadd.f32 %v777_v43, %v514_v55 }
  0xdb   : > { %v494_v52 = vmul.f32 %v779_v45, %v493_v49 }
  0xdc   : > { %v519_v5 = vsel %vm518_vm9, %v777_v43, %v515_v0 }
  0xdd   : > { %v495_v58 = vadd.f32 %v779_v45, %v494_v52  ;;  %v524_v6 = vsel %vm521_vm10, %v523_v3, %v519_v5 }
  0xde   : > { %v529_v7 = vsub.f32 1.0, %v524_v6  ;;  %v531_v10 = vmul.f32 %v524_v6, %v1148_v12 }
  0xdf   : > { %v499_v60 = vsel %vm498_vm5, %v779_v45, %v495_v58 }
  0xe0   : > { %v504_v63 = vsel %vm501_vm6, %v503_v59, %v499_v60 }
  0xe1   : > { %v526_v1 = vmul.f32 %v504_v63, %v484_v57 }
  0xe3   : > { %v527_v4 = vadd.f32 %v526_v1, %v392_v61 }
  0xe5   : > { %780 = vtanh.f32 %v527_v4 }
  0xeb   : > { %v781_v8 = vpop.eup %780 }
  0xec   : > { %v530_v9 = vmul.f32 %v781_v8, %v529_v7  ;;  %537 = sbr.rel (%p663_p1) target bundleno = 242 (0xf2), region = 64 }
  0xee   : > { %v532_v11 = vadd.f32 %v531_v10, %v530_v9 }
  0xf0   : > { %533 = vst.msk [vmem:[#allocation2] sm:$0xff] %vm402_vm2, %v532_v11 }
  0xf1   : > { %538 = vst.msk [vmem:[#allocation11] sm:$0xff] %vm402_vm2, %v532_v11 }
  0xf2 PF: > { %s1206_s12 = sadd.s32 4294967295, %s992_s23   ;;  %s549_s18 = sshll.u32 %s1199_s5, 4  ;;  %s550_s18 = int_to_ptr.hbm [resolvable:$true] %s549_s18 }
  0xf3   : > { %p707_p3 = scmp.eq.s32.totalorder %s1206_s12, 7  ;;  %s1002_s16 = smov [#allocation11]  }
  0xf4   : > { %s547_s17 = sshll.u32 %s1002_s16, 4  ;;  %s548_s17 = int_to_ptr.vmem [resolvable:$true] %s547_s17 }
  0xf5   : > { %683 = dma.vmem_to_hbm [thread:$0]  (%p707_p3), %s548_s17, 128, %s550_s18, [#allocation5]  }
  0xf6   : > { %967 = dma.done.wait (%p707_p3), [#allocation5], 128  }
  0xf7   : > { %969 = vsyncadd (%p707_p3), [#allocation5], 4294967168 }
  0xf8 PF: > { %s21_s23 = sadd.s32 1, %s992_s23   ;;  %s1207_s18 = smov %s976_s19 }
  0xf9   : > { %p18_p4 = scmp.ge.s32.totalorder %s21_s23, 10   ;;  %s1208_s19 = smov %s980_s20 }
  0xfa   : > { %s1209_s20 = smov %s1123_s13  ;;  %s1210_s21 = smov %s988_s22 }
  0xfb   : > { %s1211_s22 = smov %s1213_s6  ;;  %20 = sbr.rel (!%p18_p4) target bundleno = 7 (0x7), region = 106 }
 0x100   :  { %563 = vsyncpa [#allocation4], 1 }
 0x101   :  { %565 = vsyncpa [#allocation4 + $0x1], 1 }
 0x102   :  { %566 = vsyncpa [#allocation7], 1 }
 0x103   :  { %567 = vsyncpa [#allocation10], 1 }
 0x104   :  { %568 = vsyncpa [#allocation5], 1 }
 0x105   :  { %570 = vsyncpa [#allocation5 + $0x1], 1 }

</bundles_post_ra>
